<compile_context>
chip_gen: v7x
topology: tpu7x:2x2x1
jax: 0.10.0
libtpu: 0.0.40
codegen_flags: <defaults>
</compile_context>

<pallas_src>
import jax
import jax.numpy as jnp
from jax import lax
from jax.experimental import pallas as pl
from jax.experimental.pallas import tpu as pltpu


def _leaky_relu(x, negative_slope=0.2):
    # Matches nn.LeakyReLU(0.2) used by NLayerLeakyMLP (0.2, not the 0.01 default).
    return jnp.where(x > 0, x, negative_slope * x)


def _round_up(n, m):
    return ((n + m - 1) // m) * m


def _cdiv(a, b):
    return -(-a // b)


def mlp_encoder_kernel(x_ref, w0t_ref, wht_ref, w4t_ref, bh_ref, b4_ref, o_ref):
    """Fused 5-layer MLP; every activation is carried batch-on-lane: (feat, tile)."""
    compute_dtype = w0t_ref.dtype

    x = x_ref[...]                                               # (tile, in_f)
    # Layer 0: h_t[h, b] = sum_k W0^T[h, k] * x[b, k]   (trans_b contraction:
    # x keeps its natural layout, the result lands with batch on the lane axis).
    h = lax.dot_general(w0t_ref[...], x, (((1,), (1,)), ((), ())),
                        preferred_element_type=jnp.float32)      # (hidden, tile)
    h = _leaky_relu(h + bh_ref[0])                               # bias (hidden, 1)

    # Hidden layers: (hidden, hidden) @ (hidden, tile) -> N = tile on the MXU.
    for l in range(wht_ref.shape[0]):
        h = jnp.dot(wht_ref[l], h.astype(compute_dtype),
                    preferred_element_type=jnp.float32)          # (hidden, tile)
        h = _leaky_relu(h + bh_ref[l + 1])

    # Final layer, still transposed: (out_f, hidden) @ (hidden, tile).
    y_t = jnp.dot(w4t_ref[...], h.astype(compute_dtype),
                  preferred_element_type=jnp.float32)            # (out_f, tile)
    o_ref[...] = (y_t + b4_ref[...]).astype(o_ref.dtype)         # lane-dense store


def _choose_batch_tiling(B, batch_tile):
    """Pick (tile, n_steps). Padding-aware; mildly prefers even grids (v7x: 2 TCs)."""
    n0 = _cdiv(B, batch_tile)
    if n0 <= 1:
        return _round_up(B, 8), 1
    best = None
    for n in range(max(2, n0 - 1), n0 + 3):
        tile = _round_up(_cdiv(B, n), 128)      # lane axis of the transposed output
        bp = tile * n
        # Odd grids leave one v7x TensorCore idle for ~1 step; bias against them
        # unless the even alternative costs >10% more padding.
        score = bp * (1.0 if n % 2 == 0 else 1.1)
        if best is None or score < best[0]:
            best = (score, tile, n)
    return best[1], best[2]


def mlp_encoder_forward(x, params, *, batch_tile=2048, compute_dtype=jnp.bfloat16):
    """x: (B, in_features). params: list of (W, b), W stored (din, dout)."""
    out_dtype = x.dtype
    cdt = jnp.dtype(compute_dtype)

    B, in_f = x.shape
    (w0, b0), *hidden_params, (w_last, b_last) = params
    hidden = w0.shape[1]
    out_f = w_last.shape[1]
    assert len(hidden_params) >= 1
    for (w, _) in hidden_params:
        assert w.shape == (hidden, hidden)
    num_hidden = len(hidden_params)

    # --- pre-transposed, packed parameters (constant index maps -> VMEM-resident) ---
    w0t = w0.T.astype(cdt)                                               # (hidden, in_f)
    wht = jnp.stack([w.T for (w, _) in hidden_params]).astype(cdt)       # (L-2, hid, hid)
    w4t = w_last.T.astype(cdt)                                           # (out_f, hidden)
    bh = jnp.stack([b0] + [b for (_, b) in hidden_params]) \
            .reshape(num_hidden + 1, hidden, 1).astype(jnp.float32)      # (L-1, hid, 1)
    b4c = b_last.reshape(out_f, 1).astype(jnp.float32)                   # (out_f, 1)

    # --- batch tiling ---
    tile, n_steps = _choose_batch_tiling(B, batch_tile)
    Bp = tile * n_steps

    xc = x.astype(cdt)                 # bf16 x halves the biggest HBM read by default
    if Bp != B:
        xc = jnp.pad(xc, ((0, Bp - B), (0, 0)))

    in_specs = [
        pl.BlockSpec((tile, in_f), lambda i: (i, 0)),
        # Constant block indices: weights/biases stay VMEM-resident across steps.
        # (pl.Buffered(1) single-buffering only matters for much larger hidden dims.)
        pl.BlockSpec((hidden, in_f), lambda i: (0, 0)),
        pl.BlockSpec((num_hidden, hidden, hidden), lambda i: (0, 0, 0)),
        pl.BlockSpec((out_f, hidden), lambda i: (0, 0)),
        pl.BlockSpec((num_hidden + 1, hidden, 1), lambda i: (0, 0, 0)),
        pl.BlockSpec((out_f, 1), lambda i: (0, 0)),
    ]
    out_spec = pl.BlockSpec((out_f, tile), lambda i: (0, i))

    # Scheduler hint.
    flops = 2 * Bp * (in_f * hidden + num_hidden * hidden * hidden + hidden * out_f)
    weight_bytes = ((w0t.size + wht.size + w4t.size) * cdt.itemsize
                    + (bh.size + b4c.size) * 4)
    bytes_accessed = (Bp * in_f * cdt.itemsize
                      + Bp * out_f * jnp.dtype(out_dtype).itemsize
                      + weight_bytes)
    cost = pl.CostEstimate(flops=flops, transcendentals=0,
                           bytes_accessed=bytes_accessed)

    # Raise scoped-VMEM only if the per-tile working set needs it; cap below the
    # smallest physical VMEM of the targeted generations (v7x: 64 MiB).
    tile_bytes = tile * (2 * in_f * cdt.itemsize                       # 2x-buffered x
                         + 2 * out_f * jnp.dtype(out_dtype).itemsize   # 2x-buffered out
                         + 4 * hidden * 4)                             # f32 activations
    vmem_est = tile_bytes + 2 * weight_bytes
    compiler_kwargs = dict(dimension_semantics=("parallel",))
    if vmem_est > 12 * 1024 * 1024:
        try:
            cap = int(0.75 * pltpu.get_tpu_info().vmem_capacity_bytes)
        except Exception:
            cap = 48 * 1024 * 1024
        compiler_kwargs["vmem_limit_bytes"] = int(min(2 * vmem_est, cap))

    out_t = pl.pallas_call(
        mlp_encoder_kernel,
        out_shape=jax.ShapeDtypeStruct((out_f, Bp), out_dtype),
        grid=(n_steps,),
        in_specs=in_specs,
        out_specs=out_spec,
        cost_estimate=cost,
        compiler_params=pltpu.CompilerParams(**compiler_kwargs),
    )(xc, w0t, wht, w4t, bh, b4c)

    # (out_f, Bp) -> (B, out_f): cheap wrapper-side transpose of the small output;
    # in-kernel stores stay lane-dense.
    return out_t.T[:B]


def init_mlp_encoder_params(key, latent_size, num_layers=4, hidden_dim=64):
    """Deterministic synthetic init. Layer dims follow NLayerLeakyMLP.__init__."""
    in_features = latent_size * 5
    dims = [in_features] + [hidden_dim] * num_layers + [latent_size]
    params = []
    for i in range(len(dims) - 1):
        key, kw, kb = jax.random.split(key, 3)
        din, dout = dims[i], dims[i + 1]
        bound = 1.0 / jnp.sqrt(din)
        W = jax.random.uniform(kw, (din, dout), jnp.float32, -bound, bound)
        b = jax.random.uniform(kb, (dout,), jnp.float32, -bound, bound)
        params.append((W, b))
    return params


def mlp_encoder_reference(x, params):
    h = x
    for i, (W, b) in enumerate(params):
        h = h @ W + b
        if i < len(params) - 1:
            h = _leaky_relu(h)
    return h


if __name__ == "__main__":
    latent_size = 8          # in_features = 40, out_features = 8
    num_layers = 4
    hidden_dim = 64
    batch = 16

    key = jax.random.PRNGKey(0)
    key, kx = jax.random.split(key)
    x = jax.random.normal(kx, (batch, latent_size * 5), dtype=jnp.float32)
    params = init_mlp_encoder_params(key, latent_size, num_layers, hidden_dim)
    ref = mlp_encoder_reference(x, params)

    # Small batch, f32 matmuls: tight check of the batch-on-lane formulation.
    out_f32 = jax.block_until_ready(
        mlp_encoder_forward(x, params, compute_dtype=jnp.float32))
    assert out_f32.shape == (batch, latent_size)
    assert jnp.allclose(out_f32, ref, atol=1e-4, rtol=1e-4), "small-batch f32 mismatch"

    # Small batch, default bf16 matmul operands (f32 accumulation).
    out_bf = jax.block_until_ready(mlp_encoder_forward(x, params))
    assert out_bf.shape == (batch, latent_size)
    assert jnp.allclose(out_bf, ref, atol=1e-1, rtol=1e-1), "small-batch bf16 mismatch"

    # Larger, non-aligned batch: exercises the multi-step grid, padding-aware
    # tile choice, and slice-back of padded rows.
    big_batch = 1064
    key, kb = jax.random.split(key)
    xb = jax.random.normal(kb, (big_batch, latent_size * 5), dtype=jnp.float32)
    ref_b = mlp_encoder_reference(xb, params)

    out_b_f32 = jax.block_until_ready(
        mlp_encoder_forward(xb, params, batch_tile=512, compute_dtype=jnp.float32))
    assert out_b_f32.shape == (big_batch, latent_size)
    assert jnp.allclose(out_b_f32, ref_b, atol=1e-4, rtol=1e-4), "big-batch f32 mismatch"

    out_b_bf = jax.block_until_ready(
        mlp_encoder_forward(xb, params, batch_tile=512))
    assert jnp.allclose(out_b_bf, ref_b, atol=1e-1, rtol=1e-1), "big-batch bf16 mismatch"

    print("KERNEL_OK")
</pallas_src>

<mosaic_0001>
module attributes {stable_mosaic.version = 11 : i64} {
  func.func @mlp_encoder_kernel(%arg0: i32, %arg1: memref<16x40xf32, #tpu.memory_space<vmem>>, %arg2: memref<64x40xf32, #tpu.memory_space<vmem>>, %arg3: memref<3x64x64xf32, #tpu.memory_space<vmem>>, %arg4: memref<8x64xf32, #tpu.memory_space<vmem>>, %arg5: memref<4x64x1xf32, #tpu.memory_space<vmem>>, %arg6: memref<8x1xf32, #tpu.memory_space<vmem>>, %arg7: memref<8x16xf32, #tpu.memory_space<vmem>>) attributes {dimension_semantics = [#tpu.dimension_semantics<parallel>], iteration_bounds = array<i64: 1>, scalar_prefetch = 0 : i64, scratch_operands = 0 : i64, tpu.core_type = #tpu.core_type<tc>, window_params = [{transform_indices = @transform_0, window_bounds = array<i64: 16, 40>}, {pipeline_mode = #tpu.pipeline_mode<synchronous>, transform_indices = @transform_1, window_bounds = array<i64: 64, 40>}, {pipeline_mode = #tpu.pipeline_mode<synchronous>, transform_indices = @transform_2, window_bounds = array<i64: 3, 64, 64>}, {pipeline_mode = #tpu.pipeline_mode<synchronous>, transform_indices = @transform_3, window_bounds = array<i64: 8, 64>}, {pipeline_mode = #tpu.pipeline_mode<synchronous>, transform_indices = @transform_4, window_bounds = array<i64: 4, 64, 1>}, {pipeline_mode = #tpu.pipeline_mode<synchronous>, transform_indices = @transform_5, window_bounds = array<i64: 8, 1>}, {transform_indices = @transform_6, window_bounds = array<i64: 8, 16>}]} {
    %c0 = arith.constant 0 : index
    %c0_0 = arith.constant 0 : index
    %0 = vector.load %arg1[%c0, %c0_0] : memref<16x40xf32, #tpu.memory_space<vmem>>, vector<16x40xf32>
    %c0_1 = arith.constant 0 : index
    %c0_2 = arith.constant 0 : index
    %1 = vector.load %arg2[%c0_1, %c0_2] : memref<64x40xf32, #tpu.memory_space<vmem>>, vector<64x40xf32>
    %cst = arith.constant dense<0.000000e+00> : vector<64x16xf32>
    %2 = tpu.matmul %1, %0, %cst {dimension_numbers = #tpu.dot_dimension_numbers<[1], [1], [0], [0], [0, 0, 1, 0], [], []>} : vector<64x40xf32>, vector<16x40xf32>, vector<64x16xf32> -> vector<64x16xf32>
    %c0_3 = arith.constant 0 : index
    %c0_4 = arith.constant 0 : index
    %c0_5 = arith.constant 0 : index
    %3 = vector.load %arg5[%c0_3, %c0_4, %c0_5] : memref<4x64x1xf32, #tpu.memory_space<vmem>>, vector<1x64x1xf32>
    %4 = vector.shape_cast %3 : vector<1x64x1xf32> to vector<64x1xf32>
    %5 = vector.broadcast %4 : vector<64x1xf32> to vector<64x16xf32>
    %6 = arith.addf %2, %5 : vector<64x16xf32>
    %cst_6 = arith.constant 0.000000e+00 : f32
    %7 = vector.broadcast %cst_6 : f32 to vector<64x16xf32>
    %8 = arith.cmpf ogt, %6, %7 : vector<64x16xf32>
    %cst_7 = arith.constant 2.000000e-01 : f32
    %9 = vector.broadcast %cst_7 : f32 to vector<64x16xf32>
    %10 = arith.mulf %9, %6 : vector<64x16xf32>
    %11 = arith.select %8, %6, %10 : vector<64x16xi1>, vector<64x16xf32>
    %c0_8 = arith.constant 0 : index
    %c0_9 = arith.constant 0 : index
    %c0_10 = arith.constant 0 : index
    %12 = vector.load %arg3[%c0_8, %c0_9, %c0_10] : memref<3x64x64xf32, #tpu.memory_space<vmem>>, vector<1x64x64xf32>
    %13 = vector.shape_cast %12 : vector<1x64x64xf32> to vector<64x64xf32>
    %cst_11 = arith.constant dense<0.000000e+00> : vector<64x16xf32>
    %14 = tpu.matmul %13, %11, %cst_11 {dimension_numbers = #tpu.dot_dimension_numbers<[1], [0], [0], [1], [0, 0, 1, 1], [], []>} : vector<64x64xf32>, vector<64x16xf32>, vector<64x16xf32> -> vector<64x16xf32>
    %c1 = arith.constant 1 : index
    %c0_12 = arith.constant 0 : index
    %c0_13 = arith.constant 0 : index
    %15 = vector.load %arg5[%c1, %c0_12, %c0_13] : memref<4x64x1xf32, #tpu.memory_space<vmem>>, vector<1x64x1xf32>
    %16 = vector.shape_cast %15 : vector<1x64x1xf32> to vector<64x1xf32>
    %17 = vector.broadcast %16 : vector<64x1xf32> to vector<64x16xf32>
    %18 = arith.addf %14, %17 : vector<64x16xf32>
    %cst_14 = arith.constant 0.000000e+00 : f32
    %19 = vector.broadcast %cst_14 : f32 to vector<64x16xf32>
    %20 = arith.cmpf ogt, %18, %19 : vector<64x16xf32>
    %cst_15 = arith.constant 2.000000e-01 : f32
    %21 = vector.broadcast %cst_15 : f32 to vector<64x16xf32>
    %22 = arith.mulf %21, %18 : vector<64x16xf32>
    %23 = arith.select %20, %18, %22 : vector<64x16xi1>, vector<64x16xf32>
    %c1_16 = arith.constant 1 : index
    %c0_17 = arith.constant 0 : index
    %c0_18 = arith.constant 0 : index
    %24 = vector.load %arg3[%c1_16, %c0_17, %c0_18] : memref<3x64x64xf32, #tpu.memory_space<vmem>>, vector<1x64x64xf32>
    %25 = vector.shape_cast %24 : vector<1x64x64xf32> to vector<64x64xf32>
    %cst_19 = arith.constant dense<0.000000e+00> : vector<64x16xf32>
    %26 = tpu.matmul %25, %23, %cst_19 {dimension_numbers = #tpu.dot_dimension_numbers<[1], [0], [0], [1], [0, 0, 1, 1], [], []>} : vector<64x64xf32>, vector<64x16xf32>, vector<64x16xf32> -> vector<64x16xf32>
    %c2 = arith.constant 2 : index
    %c0_20 = arith.constant 0 : index
    %c0_21 = arith.constant 0 : index
    %27 = vector.load %arg5[%c2, %c0_20, %c0_21] : memref<4x64x1xf32, #tpu.memory_space<vmem>>, vector<1x64x1xf32>
    %28 = vector.shape_cast %27 : vector<1x64x1xf32> to vector<64x1xf32>
    %29 = vector.broadcast %28 : vector<64x1xf32> to vector<64x16xf32>
    %30 = arith.addf %26, %29 : vector<64x16xf32>
    %cst_22 = arith.constant 0.000000e+00 : f32
    %31 = vector.broadcast %cst_22 : f32 to vector<64x16xf32>
    %32 = arith.cmpf ogt, %30, %31 : vector<64x16xf32>
    %cst_23 = arith.constant 2.000000e-01 : f32
    %33 = vector.broadcast %cst_23 : f32 to vector<64x16xf32>
    %34 = arith.mulf %33, %30 : vector<64x16xf32>
    %35 = arith.select %32, %30, %34 : vector<64x16xi1>, vector<64x16xf32>
    %c2_24 = arith.constant 2 : index
    %c0_25 = arith.constant 0 : index
    %c0_26 = arith.constant 0 : index
    %36 = vector.load %arg3[%c2_24, %c0_25, %c0_26] : memref<3x64x64xf32, #tpu.memory_space<vmem>>, vector<1x64x64xf32>
    %37 = vector.shape_cast %36 : vector<1x64x64xf32> to vector<64x64xf32>
    %cst_27 = arith.constant dense<0.000000e+00> : vector<64x16xf32>
    %38 = tpu.matmul %37, %35, %cst_27 {dimension_numbers = #tpu.dot_dimension_numbers<[1], [0], [0], [1], [0, 0, 1, 1], [], []>} : vector<64x64xf32>, vector<64x16xf32>, vector<64x16xf32> -> vector<64x16xf32>
    %c3 = arith.constant 3 : index
    %c0_28 = arith.constant 0 : index
    %c0_29 = arith.constant 0 : index
    %39 = vector.load %arg5[%c3, %c0_28, %c0_29] : memref<4x64x1xf32, #tpu.memory_space<vmem>>, vector<1x64x1xf32>
    %40 = vector.shape_cast %39 : vector<1x64x1xf32> to vector<64x1xf32>
    %41 = vector.broadcast %40 : vector<64x1xf32> to vector<64x16xf32>
    %42 = arith.addf %38, %41 : vector<64x16xf32>
    %cst_30 = arith.constant 0.000000e+00 : f32
    %43 = vector.broadcast %cst_30 : f32 to vector<64x16xf32>
    %44 = arith.cmpf ogt, %42, %43 : vector<64x16xf32>
    %cst_31 = arith.constant 2.000000e-01 : f32
    %45 = vector.broadcast %cst_31 : f32 to vector<64x16xf32>
    %46 = arith.mulf %45, %42 : vector<64x16xf32>
    %47 = arith.select %44, %42, %46 : vector<64x16xi1>, vector<64x16xf32>
    %c0_32 = arith.constant 0 : index
    %c0_33 = arith.constant 0 : index
    %48 = vector.load %arg4[%c0_32, %c0_33] : memref<8x64xf32, #tpu.memory_space<vmem>>, vector<8x64xf32>
    %cst_34 = arith.constant dense<0.000000e+00> : vector<8x16xf32>
    %49 = tpu.matmul %48, %47, %cst_34 {dimension_numbers = #tpu.dot_dimension_numbers<[1], [0], [0], [1], [0, 0, 1, 1], [], []>} : vector<8x64xf32>, vector<64x16xf32>, vector<8x16xf32> -> vector<8x16xf32>
    %c0_35 = arith.constant 0 : index
    %c0_36 = arith.constant 0 : index
    %50 = vector.load %arg6[%c0_35, %c0_36] : memref<8x1xf32, #tpu.memory_space<vmem>>, vector<8x1xf32>
    %51 = vector.broadcast %50 : vector<8x1xf32> to vector<8x16xf32>
    %52 = arith.addf %49, %51 : vector<8x16xf32>
    %c0_37 = arith.constant 0 : index
    %c0_38 = arith.constant 0 : index
    %53 = vector.load %arg7[%c0_37, %c0_38] : memref<8x16xf32, #tpu.memory_space<vmem>>, vector<8x16xf32>
    tpu.vector_store %arg7[%c0_37, %c0_38], %52 {strides = array<i32>} : memref<8x16xf32, #tpu.memory_space<vmem>>, vector<8x16xf32>,
    return
  }
  func.func @transform_0(%arg0: i32) -> (i32, i32) {
    %c0_i32 = arith.constant 0 : i32
    %c0_i32_0 = arith.constant 0 : i32
    return %arg0, %c0_i32 : i32, i32
  }
  func.func @transform_1(%arg0: i32) -> (i32, i32) {
    %c0_i32 = arith.constant 0 : i32
    %c0_i32_0 = arith.constant 0 : i32
    %c0_i32_1 = arith.constant 0 : i32
    return %c0_i32, %c0_i32_0 : i32, i32
  }
  func.func @transform_2(%arg0: i32) -> (i32, i32, i32) {
    %c0_i32 = arith.constant 0 : i32
    %c0_i32_0 = arith.constant 0 : i32
    %c0_i32_1 = arith.constant 0 : i32
    %c0_i32_2 = arith.constant 0 : i32
    return %c0_i32, %c0_i32_0, %c0_i32_1 : i32, i32, i32
  }
  func.func @transform_3(%arg0: i32) -> (i32, i32) {
    %c0_i32 = arith.constant 0 : i32
    %c0_i32_0 = arith.constant 0 : i32
    %c0_i32_1 = arith.constant 0 : i32
    return %c0_i32, %c0_i32_0 : i32, i32
  }
  func.func @transform_4(%arg0: i32) -> (i32, i32, i32) {
    %c0_i32 = arith.constant 0 : i32
    %c0_i32_0 = arith.constant 0 : i32
    %c0_i32_1 = arith.constant 0 : i32
    %c0_i32_2 = arith.constant 0 : i32
    return %c0_i32, %c0_i32_0, %c0_i32_1 : i32, i32, i32
  }
  func.func @transform_5(%arg0: i32) -> (i32, i32) {
    %c0_i32 = arith.constant 0 : i32
    %c0_i32_0 = arith.constant 0 : i32
    %c0_i32_1 = arith.constant 0 : i32
    return %c0_i32, %c0_i32_0 : i32, i32
  }
  func.func @transform_6(%arg0: i32) -> (i32, i32) {
    %c0_i32 = arith.constant 0 : i32
    %c0_i32_0 = arith.constant 0 : i32
    return %c0_i32, %arg0 : i32, i32
  }
}

</mosaic_0001>

<bundles_post_ra>
// kernel: tpu_custom_call.1
= control target key start
LH: loop header
LB: loop body
LE: loop exit
PB: predicated region body
PF: predicated region fallthrough
CT: control target
= control target key end

     0   :  { %vm82_vm0 = vcmask 326656   ;;  %v1329_v4 = vmov 0   ;;  %s1620_s0 = inlined_call_operand.vmem [shape: f32[16,40], index: 0, kind: input, shape index: {}]   ;;  %s1621_s1 = inlined_call_operand.vmem [shape: f32[64,40], index: 1, kind: input, shape index: {}]   ;;  %s1622_s2 = inlined_call_operand.vmem [shape: f32[3,64,64], index: 2, kind: input, shape index: {}]   ;;  %s1623_s3 = inlined_call_operand.vmem [shape: f32[8,64], index: 3, kind: input, shape index: {}]   ;;  %s1624_s4 = inlined_call_operand.vmem [shape: f32[4,64,1], index: 4, kind: input, shape index: {}]   ;;  %s1625_s5 = inlined_call_operand.vmem [shape: f32[8,1], index: 5, kind: input, shape index: {}]   ;;  %s1626_s6 = inlined_call_operand.hbm [shape: f32[8,16], index: 6, kind: output, shape index: {}]  }
   0x1   :  { %v24_v0 = vld [vmem:[%s1620_s0] sm:$0xff]  ;;  %v25_v1 = vld [vmem:[%s1620_s0 + $0x8] sm:$0xff]  ;;  %vm1233_vm1 = vmpackc.low %vm82_vm0, %vm82_vm0  ;;  %1303 = vset.pattern.permute.xlu0 %v1329_v4  ;;  %1304 = vset.pattern.permute.xlu1 %v1329_v4 }
   0x2   :  { %v26_v2 = vld [vmem:[%s1621_s1] sm:$0xff]  ;;  %v1232_v3 = vpack.c.bf16 %v25_v1, %v24_v0  ;;  %v36_v6 = vld [vmem:[%s1624_s4 + $0x10] sm:$0xff]  ;;  %v35_v7 = vld [vmem:[%s1624_s4 + $0x8] sm:$0xff] }
   0x3   :  { %1117 = vmatprep.mubr.msk.f32.mxu0 %vm82_vm0, %v26_v2  ;;  %v34_v5 = vld [vmem:[%s1624_s4] sm:$0xff]  ;;  %54 = vperm.xlu1 %1304, %v36_v6   ;;  %v37_v8 = vld [vmem:[%s1624_s4 + $0x18] sm:$0xff]  ;;  %v27_v9 = vld [vmem:[%s1621_s1 + $0x8] sm:$0xff] }
   0x4   :  { %1234 = vmatprep.subr.msk.bf16.mxu0 %vm1233_vm1, %v1232_v3  ;;  %44 = vperm.xlu0 %1303, %v34_v5   ;;  %v28_v10 = vld [vmem:[%s1621_s1 + $0x10] sm:$0xff]  ;;  %v38_v11 = vld [vmem:[%s1624_s4 + $0x20] sm:$0xff]  ;;  %v39_v12 = vld [vmem:[%s1624_s4 + $0x28] sm:$0xff] }
   0x5   :  { %1237 = vmatpush3.bf16.xpose.msk.msra.mxu0 %vm1233_vm1, %v1232_v3  ;;  %v29_v13 = vld [vmem:[%s1621_s1 + $0x18] sm:$0xff]  ;;  %v30_v14 = vld [vmem:[%s1621_s1 + $0x20] sm:$0xff]  ;;  %v40_v15 = vld [vmem:[%s1624_s4 + $0x30] sm:$0xff] }
   0x6   :  { %v41_v16 = vld [vmem:[%s1624_s4 + $0x38] sm:$0xff] }
   0x7   :  { %59 = vperm.xlu1 %1304, %v37_v8  }
   0x8   :  { %49 = vperm.xlu0 %1303, %v35_v7  }
   0xb   :  { %69 = vperm.xlu1 %1304, %v39_v12  }
   0xc   :  { %1118 = vmatmul.mubr.msk.f32.vlgmr.msra.gmra.mrb[0].mxu0 %vm82_vm0, %v27_v9  ;;  %64 = vperm.xlu0 %1303, %v38_v11  }
   0xd   :  { %1120 = vmatprep.mubr.msk.f32.mxu0 %vm82_vm0, %v28_v10 }
   0xe   :  { %11 = vsyncpa [#allocation3], 0  ;;  %v31_v17 = vld [vmem:[%s1621_s1 + $0x28] sm:$0xff]  ;;  %v32_v18 = vld [vmem:[%s1621_s1 + $0x30] sm:$0xff]  ;;  %vm299_vm2 = vcmask 523264   ;;  %s1333_s23 = smov [#allocation2]  }
   0xf   :  { %v981_v19 = vld [vmem:[%s1624_s4 + $0x40] sm:$0xff]  ;;  %79 = vperm.xlu1 %1304, %v41_v16   ;;  %v982_v20 = vld [vmem:[%s1624_s4 + $0x48] sm:$0xff]  ;;  %v33_v21 = vld [vmem:[%s1621_s1 + $0x38] sm:$0xff]  ;;  %s963_s24 = sshll.u32 %s1333_s23, 4  ;;  %s964_s24 = int_to_ptr.vmem [resolvable:$true] %s963_s24 }
  0x10   :  { %1121 = vmatmul.mubr.msk.f32.gmra.mrb[2].mxu0 %vm82_vm0, %v29_v13  ;;  %74 = vperm.xlu0 %1303, %v40_v15   ;;  %v983_v22 = vld [vmem:[%s1624_s4 + $0x50] sm:$0xff]  ;;  %v984_v23 = vld [vmem:[%s1624_s4 + $0x58] sm:$0xff]  ;;  %v985_v24 = vld [vmem:[%s1624_s4 + $0x60] sm:$0xff]  ;;  %s1305_s25 = scalar_lea.vmem %s964_s24, 128  ;;  %p1310_p1 = scmp.lt.s32.totalorder %s964_s24, %s964_s24 }
  0x11   :  { %1123 = vmatprep.mubr.msk.f32.mxu0 %vm82_vm0, %v30_v14  ;;  %v986_v25 = vld [vmem:[%s1624_s4 + $0x68] sm:$0xff]  ;;  %v987_v26 = vld [vmem:[%s1624_s4 + $0x70] sm:$0xff]  ;;  %v988_v27 = vld [vmem:[%s1624_s4 + $0x78] sm:$0xff]  ;;  %p1306_p0 = scmp.ne.s32.totalorder %s964_s24, %s1305_s25  ;;  %p1311_p2 = scmp.lt.s32.totalorder %s1305_s25, %s1305_s25 }
  0x12   :  { %v1005_v28 = vld [vmem:[%s1624_s4 + $0x80] sm:$0xff]  ;;  %v1006_v29 = vld [vmem:[%s1624_s4 + $0x88] sm:$0xff]  ;;  %v1007_v30 = vld [vmem:[%s1624_s4 + $0x90] sm:$0xff] }
  0x13   :  { %266 = vperm.xlu1 %1304, %v982_v20   ;;  %v1008_v31 = vld [vmem:[%s1624_s4 + $0x98] sm:$0xff]  ;;  %v1009_v32 = vld [vmem:[%s1624_s4 + $0xa0] sm:$0xff]  ;;  %v1010_v33 = vld [vmem:[%s1624_s4 + $0xa8] sm:$0xff]  ;;  %p1312_p3 = por %p1311_p2, %p1310_p1 }
  0x14   :  { %1124 = vmatmul.mubr.msk.f32.gmra.mrb[4].mxu0 %vm82_vm0, %v31_v17  ;;  %261 = vperm.xlu0 %1303, %v981_v19   ;;  %v1011_v34 = vld [vmem:[%s1624_s4 + $0xb0] sm:$0xff]  ;;  %v1012_v35 = vld [vmem:[%s1624_s4 + $0xb8] sm:$0xff]  ;;  %v1029_v36 = vld [vmem:[%s1624_s4 + $0xc0] sm:$0xff] }
  0x15   :  { %1126 = vmatprep.mubr.msk.f32.mxu0 %vm82_vm0, %v32_v18  ;;  %v1030_v37 = vld [vmem:[%s1624_s4 + $0xc8] sm:$0xff]  ;;  %v1031_v38 = vld [vmem:[%s1624_s4 + $0xd0] sm:$0xff]  ;;  %v1032_v39 = vld [vmem:[%s1624_s4 + $0xd8] sm:$0xff]  ;;  %p1313_p4 = pnand %p1312_p3, %p1306_p0 }
  0x16   :  { %v1033_v40 = vld [vmem:[%s1624_s4 + $0xe0] sm:$0xff]  ;;  %v1034_v41 = vld [vmem:[%s1624_s4 + $0xe8] sm:$0xff]  ;;  %v1035_v42 = vld [vmem:[%s1624_s4 + $0xf0] sm:$0xff] }
  0x17   :  { %276 = vperm.xlu1 %1304, %v984_v23   ;;  %v1036_v43 = vld [vmem:[%s1624_s4 + $0xf8] sm:$0xff]  ;;  %v876_v44 = vld [vmem:[%s1625_s5] sm:$0xff] }
  0x18   :  { %1127 = vmatmul.mubr.msk.f32.gmra.mrb[6].mxu0 %vm82_vm0, %v33_v21  ;;  %271 = vperm.xlu0 %1303, %v983_v22   ;;  %v242_v45 = vld [vmem:[%s1622_s2] sm:$0xff] }
  0x19   :  { %1145 = vmatprep.mubr.msk.f32.mxu1 %vm299_vm2, %v242_v45 }
  0x1b   :  { %286 = vperm.xlu1 %1304, %v986_v25  }
  0x1c   :  { %281 = vperm.xlu0 %1303, %v985_v24  }
  0x1f   :  { %296 = vperm.xlu1 %1304, %v988_v27   ;;  %v244_v27 = vld [vmem:[%s1622_s2 + $0x10] sm:$0xff] }
  0x20   :  { %291 = vperm.xlu0 %1303, %v987_v26   ;;  %v243_v26 = vld [vmem:[%s1622_s2 + $0x8] sm:$0xff] }
  0x23   :  { %478 = vperm.xlu1 %1304, %v1006_v29   ;;  %v246_v29 = vld [vmem:[%s1622_s2 + $0x20] sm:$0xff] }
  0x24   :  { %473 = vperm.xlu0 %1303, %v1005_v28   ;;  %v245_v28 = vld [vmem:[%s1622_s2 + $0x18] sm:$0xff] }
  0x27   :  { %488 = vperm.xlu1 %1304, %v1008_v31   ;;  %v248_v31 = vld [vmem:[%s1622_s2 + $0x30] sm:$0xff] }
  0x28   :  { %483 = vperm.xlu0 %1303, %v1007_v30   ;;  %v247_v30 = vld [vmem:[%s1622_s2 + $0x28] sm:$0xff] }
  0x2b   :  { %498 = vperm.xlu1 %1304, %v1010_v33   ;;  %v997_v33 = vld [vmem:[%s1622_s2 + $0x40] sm:$0xff] }
  0x2c   :  { %493 = vperm.xlu0 %1303, %v1009_v32   ;;  %v249_v32 = vld [vmem:[%s1622_s2 + $0x38] sm:$0xff]  ;;  %1173 = vmatprep.mubr.msk.f32.mxu0 %vm299_vm2, %v997_v33 }
  0x2f   :  { %508 = vperm.xlu1 %1304, %v1012_v35  }
  0x30   :  { %503 = vperm.xlu0 %1303, %v1011_v34  }
  0x33   :  { %689 = vperm.xlu1 %1304, %v1030_v37  }
  0x34   :  { %684 = vperm.xlu0 %1303, %v1029_v36  }
  0x37   :  { %699 = vperm.xlu1 %1304, %v1032_v39  }
  0x38   :  { %694 = vperm.xlu0 %1303, %v1031_v38  }
  0x3b   :  { %709 = vperm.xlu1 %1304, %v1034_v41  }
  0x3c   :  { %704 = vperm.xlu0 %1303, %v1033_v40  }
  0x3f   :  { %719 = vperm.xlu1 %1304, %v1036_v43  }
  0x40   :  { %714 = vperm.xlu0 %1303, %v1035_v42  }
  0x44   :  { %879 = vperm.xlu0 %1303, %v876_v44  }
  0x82   :  { %v55_v47 = vpop.permute.xlu1 %54 }
  0x83   :  { %v45_v46 = vpop.permute.xlu0 %44 }
  0x86   :  { %v60_v49 = vpop.permute.xlu1 %59 }
  0x87   :  { %v50_v48 = vpop.permute.xlu0 %49 }
  0x8a   :  { %v70_v60 = vpop.permute.xlu1 %69 }
  0x8b   :  { %v65_v63 = vpop.permute.xlu0 %64 }
  0x8e   :  { %v80_v11 = vpop.permute.xlu1 %79 }
  0x8f   :  { %v75_v14 = vpop.permute.xlu0 %74 }
  0x92   :  { %v267_v34 = vpop.permute.xlu1 %266 }
  0x93   :  { %v262_v35 = vpop.permute.xlu0 %261 }
  0x96   :  { %v277_v36 = vpop.permute.xlu1 %276 }
  0x97   :  { %v272_v38 = vpop.permute.xlu0 %271 }
  0xdf   :  { %v1119_v50 = vpop.f32.mrb[0].mxu0 }
  0xe0   :  { %v185_v51 = vadd.f32 %v1119_v50, %v50_v48  ;;  %v179_v52 = vpop.f32.mrb[1].mxu0  ;;  %v287_v48 = vpop.permute.xlu1 %286 }
  0xe1   :  { %v180_v53 = vadd.f32 %v179_v52, %v45_v46 }
  0xe2   :  { %v227_v54 = vmul.f32 0.2, %v185_v51  ;;  %vm219_vm3 = vcmp.gt.f32.partialorder %v185_v51, 0.0 }
  0xe3   :  { %v226_v55 = vmul.f32 0.2, %v180_v53  ;;  %v1122_v56 = vpop.f32.mrb[2].mxu0  ;;  %vm218_vm4 = vcmp.gt.f32.partialorder %v180_v53, 0.0 }
  0xe4   :  { %v195_v57 = vadd.f32 %v1122_v56, %v60_v49  ;;  %v189_v58 = vpop.f32.mrb[3].mxu0  ;;  %v235_v59 = vsel %vm219_vm3, %v185_v51, %v227_v54  ;;  %v282_v51 = vpop.permute.xlu0 %281 }
  0xe5   :  { %v190_v61 = vadd.f32 %v189_v58, %v55_v47  ;;  %v234_v62 = vsel %vm218_vm4, %v180_v53, %v226_v55 }
  0xe6   :  { %vm221_vm5 = vcmp.gt.f32.partialorder %v195_v57, 0.0  ;;  %v229_v0 = vmul.f32 0.2, %v195_v57  ;;  %v1238_v1 = vpack.c.bf16 %v235_v59, %v234_v62 }
  0xe7   :  { %vm220_vm6 = vcmp.gt.f32.partialorder %v190_v61, 0.0  ;;  %v228_v2 = vmul.f32 0.2, %v190_v61  ;;  %v1125_v3 = vpop.f32.mrb[4].mxu0 }
  0xe8   :  { %v205_v4 = vadd.f32 %v1125_v3, %v70_v60  ;;  %v199_v5 = vpop.f32.mrb[5].mxu0  ;;  %1239 = vmatprep.subr.bf16.mxu1 %v1238_v1  ;;  %v237_v6 = vsel %vm221_vm5, %v195_v57, %v229_v0 }
  0xe9   :  { %v200_v7 = vadd.f32 %v199_v5, %v65_v63  ;;  %1241 = vmatpush3.bf16.msra.mxu1 %v1238_v1  ;;  %v236_v8 = vsel %vm220_vm6, %v190_v61, %v228_v2  ;;  %v297_v63 = vpop.permute.xlu1 %296  ;;  %v292_v2 = vpop.permute.xlu0 %291 }
  0xea   :  { %vm223_vm7 = vcmp.gt.f32.partialorder %v205_v4, 0.0  ;;  %v231_v9 = vmul.f32 0.2, %v205_v4  ;;  %v1242_v10 = vpack.c.bf16 %v237_v6, %v236_v8 }
  0xeb   :  { %vm222_vm8 = vcmp.gt.f32.partialorder %v200_v7, 0.0  ;;  %v230_v12 = vmul.f32 0.2, %v200_v7  ;;  %v1128_v13 = vpop.f32.mrb[6].mxu0 }
  0xec   :  { %v215_v15 = vadd.f32 %v1128_v13, %v80_v11  ;;  %v209_v16 = vpop.f32.mrb[7].mxu0  ;;  %1243 = vmatprep.subr.bf16.mxu1 %v1242_v10  ;;  %v239_v17 = vsel %vm223_vm7, %v205_v4, %v231_v9 }
  0xed   :  { %v210_v18 = vadd.f32 %v209_v16, %v75_v14  ;;  %1245 = vmatpush3.bf16.msra.mxu1 %v1242_v10  ;;  %v238_v19 = vsel %vm222_vm8, %v200_v7, %v230_v12  ;;  %v998_v14 = vld [vmem:[%s1622_s2 + $0x48] sm:$0xff]  ;;  %v1000_v16 = vld [vmem:[%s1622_s2 + $0x58] sm:$0xff] }
  0xee   :  { %vm225_vm9 = vcmp.gt.f32.partialorder %v215_v15, 0.0  ;;  %v233_v20 = vmul.f32 0.2, %v215_v15  ;;  %v1246_v21 = vpack.c.bf16 %v239_v17, %v238_v19  ;;  %v1001_v17 = vld [vmem:[%s1622_s2 + $0x60] sm:$0xff]  ;;  %v1003_v19 = vld [vmem:[%s1622_s2 + $0x70] sm:$0xff] }
  0xef   :  { %vm224_vm10 = vcmp.gt.f32.partialorder %v210_v18, 0.0  ;;  %v232_v22 = vmul.f32 0.2, %v210_v18 }
  0xf0   :  { %1247 = vmatprep.subr.bf16.mxu1 %v1246_v21  ;;  %v241_v23 = vsel %vm225_vm9, %v215_v15, %v233_v20  ;;  %v999_v15 = vld [vmem:[%s1622_s2 + $0x50] sm:$0xff]  ;;  %v1004_v20 = vld [vmem:[%s1622_s2 + $0x78] sm:$0xff] }
  0xf1   :  { %1249 = vmatpush3.bf16.msra.mxu1 %v1246_v21  ;;  %v240_v24 = vsel %vm224_vm10, %v210_v18, %v232_v22  ;;  %v1002_v18 = vld [vmem:[%s1622_s2 + $0x68] sm:$0xff]  ;;  %v1021_v21 = vld [vmem:[%s1622_s2 + $0x80] sm:$0xff]  ;;  %v479_v22 = vpop.permute.xlu1 %478 }
  0xf2   :  { %v1250_v25 = vpack.c.bf16 %v241_v23, %v240_v24  ;;  %v474_v23 = vpop.permute.xlu0 %473 }
  0xf4   :  { %1251 = vmatprep.subr.bf16.mxu1 %v1250_v25 }
  0xf5   :  { %1253 = vmatpush3.bf16.msra.mxu1 %v1250_v25  ;;  %v489_v24 = vpop.permute.xlu1 %488 }
  0xf8   :  { %1146 = vmatmul.mubr.msk.f32.vlgmr.msra.gmra.mrb[0].mxu1 %vm299_vm2, %v243_v26  ;;  %v484_v26 = vpop.permute.xlu0 %483 }
  0xf9   :  { %1148 = vmatprep.mubr.msk.f32.mxu1 %vm299_vm2, %v244_v27 }
  0xfc   :  { %1149 = vmatmul.mubr.msk.f32.gmra.mrb[2].mxu1 %vm299_vm2, %v245_v28 }
  0xfd   :  { %1151 = vmatprep.mubr.msk.f32.mxu1 %vm299_vm2, %v246_v29 }
 0x100   :  { %1152 = vmatmul.mubr.msk.f32.gmra.mrb[4].mxu1 %vm299_vm2, %v247_v30 }
 0x101   :  { %1154 = vmatprep.mubr.msk.f32.mxu1 %vm299_vm2, %v248_v31 }
 0x104   :  { %1155 = vmatmul.mubr.msk.f32.gmra.mrb[6].mxu1 %vm299_vm2, %v249_v32 }
 0x105   :  { %1201 = vmatprep.mubr.msk.f32.mxu1 %vm299_vm2, %v1021_v21 }
 0x1cb   :  { %v1147_v37 = vpop.f32.mrb[0].mxu1 }
 0x1cc   :  { %v396_v39 = vadd.f32 %v1147_v37, %v267_v34  ;;  %v390_v40 = vpop.f32.mrb[1].mxu1 }
 0x1cd   :  { %v391_v41 = vadd.f32 %v390_v40, %v262_v35 }
 0x1ce   :  { %vm430_vm11 = vcmp.gt.f32.partialorder %v396_v39, 0.0  ;;  %v438_v42 = vmul.f32 0.2, %v396_v39 }
 0x1cf   :  { %vm429_vm12 = vcmp.gt.f32.partialorder %v391_v41, 0.0  ;;  %v437_v43 = vmul.f32 0.2, %v391_v41  ;;  %v1150_v44 = vpop.f32.mrb[2].mxu1 }
 0x1d0   :  { %v406_v45 = vadd.f32 %v1150_v44, %v277_v36  ;;  %v400_v46 = vpop.f32.mrb[3].mxu1  ;;  %v446_v47 = vsel %vm430_vm11, %v396_v39, %v438_v42  ;;  %v499_v36 = vpop.permute.xlu1 %498 }
 0x1d1   :  { %v401_v49 = vadd.f32 %v400_v46, %v272_v38  ;;  %v445_v50 = vsel %vm429_vm12, %v391_v41, %v437_v43  ;;  %v494_v39 = vpop.permute.xlu0 %493  ;;  %vm1331_vm12 = vmmov 0  }
 0x1d2   :  { %vm432_vm13 = vcmp.gt.f32.partialorder %v406_v45, 0.0  ;;  %v440_v52 = vmul.f32 0.2, %v406_v45  ;;  %v1254_v53 = vpack.c.bf16 %v446_v47, %v445_v50 }
 0x1d3   :  { %vm431_vm14 = vcmp.gt.f32.partialorder %v401_v49, 0.0  ;;  %v439_v54 = vmul.f32 0.2, %v401_v49  ;;  %v1153_v55 = vpop.f32.mrb[4].mxu1 }
 0x1d4   :  { %v416_v56 = vadd.f32 %v1153_v55, %v287_v48  ;;  %v410_v57 = vpop.f32.mrb[5].mxu1  ;;  %1255 = vmatprep.subr.bf16.mxu0 %v1254_v53  ;;  %v448_v58 = vsel %vm432_vm13, %v406_v45, %v440_v52 }
 0x1d5   :  { %v411_v59 = vadd.f32 %v410_v57, %v282_v51  ;;  %1257 = vmatpush3.bf16.msra.mxu0 %v1254_v53  ;;  %v447_v60 = vsel %vm431_vm14, %v401_v49, %v439_v54  ;;  %v509_v51 = vpop.permute.xlu1 %508  ;;  %v504_v54 = vpop.permute.xlu0 %503 }
 0x1d6   :  { %vm434_vm15 = vcmp.gt.f32.partialorder %v416_v56, 0.0  ;;  %v442_v61 = vmul.f32 0.2, %v416_v56  ;;  %v1258_v62 = vpack.c.bf16 %v448_v58, %v447_v60 }
 0x1d7   :  { %vm433_vm0 = vcmp.gt.f32.partialorder %v411_v59, 0.0  ;;  %v441_v0 = vmul.f32 0.2, %v411_v59  ;;  %v1156_v1 = vpop.f32.mrb[6].mxu1 }
 0x1d8   :  { %v426_v3 = vadd.f32 %v1156_v1, %v297_v63  ;;  %v420_v4 = vpop.f32.mrb[7].mxu1  ;;  %1259 = vmatprep.subr.bf16.mxu0 %v1258_v62  ;;  %v450_v5 = vsel %vm434_vm15, %v416_v56, %v442_v61 }
 0x1d9   :  { %v421_v6 = vadd.f32 %v420_v4, %v292_v2  ;;  %1261 = vmatpush3.bf16.msra.mxu0 %v1258_v62  ;;  %v449_v7 = vsel %vm433_vm0, %v411_v59, %v441_v0  ;;  %v1022_v2 = vld [vmem:[%s1622_s2 + $0x88] sm:$0xff]  ;;  %v1024_v4 = vld [vmem:[%s1622_s2 + $0x98] sm:$0xff] }
 0x1da   :  { %vm436_vm1 = vcmp.gt.f32.partialorder %v426_v3, 0.0  ;;  %v444_v8 = vmul.f32 0.2, %v426_v3  ;;  %v1262_v9 = vpack.c.bf16 %v450_v5, %v449_v7  ;;  %v1025_v5 = vld [vmem:[%s1622_s2 + $0xa0] sm:$0xff]  ;;  %v1027_v7 = vld [vmem:[%s1622_s2 + $0xb0] sm:$0xff] }
 0x1db   :  { %vm435_vm3 = vcmp.gt.f32.partialorder %v421_v6, 0.0  ;;  %v443_v10 = vmul.f32 0.2, %v421_v6 }
 0x1dc   :  { %1263 = vmatprep.subr.bf16.mxu0 %v1262_v9  ;;  %v452_v11 = vsel %vm436_vm1, %v426_v3, %v444_v8  ;;  %v1023_v3 = vld [vmem:[%s1622_s2 + $0x90] sm:$0xff]  ;;  %v1028_v8 = vld [vmem:[%s1622_s2 + $0xb8] sm:$0xff] }
 0x1dd   :  { %1265 = vmatpush3.bf16.msra.mxu0 %v1262_v9  ;;  %v451_v12 = vsel %vm435_vm3, %v421_v6, %v443_v10  ;;  %v1026_v6 = vld [vmem:[%s1622_s2 + $0xa8] sm:$0xff]  ;;  %v1330_v9 = vmov 0.0|0.0   ;;  %v1332_v10 = vmov 0.0  }
 0x1de   :  { %v1266_v13 = vpack.c.bf16 %v452_v11, %v451_v12  ;;  %v690_v11 = vpop.permute.xlu1 %689  ;;  %v685_v12 = vpop.permute.xlu0 %684 }
 0x1e0   :  { %1267 = vmatprep.subr.bf16.mxu0 %v1266_v13 }
 0x1e1   :  { %1269 = vmatpush3.bf16.msra.mxu0 %v1266_v13 }
 0x1e2   :  { %1286 = vmatprep.subr.bf16.mxu0 %v1330_v9  ;;  %v700_v13 = vpop.permute.xlu1 %699 }
 0x1e4   :  { %1174 = vmatmul.mubr.msk.f32.vlgmr.msra.gmra.mrb[8].mxu0 %vm299_vm2, %v998_v14 }
 0x1e5   :  { %1176 = vmatprep.mubr.msk.f32.mxu0 %vm299_vm2, %v999_v15  ;;  %v695_v15 = vpop.permute.xlu0 %694 }
 0x1e8   :  { %1177 = vmatmul.mubr.msk.f32.gmra.mrb[10].mxu0 %vm299_vm2, %v1000_v16 }
 0x1e9   :  { %1179 = vmatprep.mubr.msk.f32.mxu0 %vm299_vm2, %v1001_v17 }
 0x1ec   :  { %1180 = vmatmul.mubr.msk.f32.gmra.mrb[12].mxu0 %vm299_vm2, %v1002_v18 }
 0x1ed   :  { %1182 = vmatprep.mubr.msk.f32.mxu0 %vm299_vm2, %v1003_v19 }
 0x1f0   :  { %1183 = vmatmul.mubr.msk.f32.gmra.mrb[14].mxu0 %vm299_vm2, %v1004_v20 }
 0x1f1   :  { %1229 = vmatprep.mubr.msk.f32.mxu0 %vm1331_vm12, %v1332_v10 }
 0x2b7   :  { %v1175_v25 = vpop.f32.mrb[8].mxu0 }
 0x2b8   :  { %v607_v27 = vadd.f32 %v1175_v25, %v479_v22  ;;  %v601_v28 = vpop.f32.mrb[9].mxu0  ;;  %v710_v25 = vpop.permute.xlu1 %709 }
 0x2b9   :  { %v602_v29 = vadd.f32 %v601_v28, %v474_v23  ;;  %v705_v28 = vpop.permute.xlu0 %704 }
 0x2ba   :  { %vm641_vm4 = vcmp.gt.f32.partialorder %v607_v27, 0.0  ;;  %v649_v30 = vmul.f32 0.2, %v607_v27 }
 0x2bb   :  { %vm640_vm5 = vcmp.gt.f32.partialorder %v602_v29, 0.0  ;;  %v648_v31 = vmul.f32 0.2, %v602_v29  ;;  %v1178_v32 = vpop.f32.mrb[10].mxu0 }
 0x2bc   :  { %v617_v33 = vadd.f32 %v1178_v32, %v489_v24  ;;  %v611_v34 = vpop.f32.mrb[11].mxu0  ;;  %v657_v35 = vsel %vm641_vm4, %v607_v27, %v649_v30 }
 0x2bd   :  { %v612_v37 = vadd.f32 %v611_v34, %v484_v26  ;;  %v656_v38 = vsel %vm640_vm5, %v602_v29, %v648_v31 }
 0x2be   :  { %vm643_vm6 = vcmp.gt.f32.partialorder %v617_v33, 0.0  ;;  %v651_v40 = vmul.f32 0.2, %v617_v33  ;;  %v1270_v41 = vpack.c.bf16 %v657_v35, %v656_v38 }
 0x2bf   :  { %vm642_vm7 = vcmp.gt.f32.partialorder %v612_v37, 0.0  ;;  %v650_v42 = vmul.f32 0.2, %v612_v37  ;;  %v1181_v43 = vpop.f32.mrb[12].mxu0 }
 0x2c0   :  { %v627_v44 = vadd.f32 %v1181_v43, %v499_v36  ;;  %v621_v45 = vpop.f32.mrb[13].mxu0  ;;  %1271 = vmatprep.subr.bf16.mxu1 %v1270_v41  ;;  %v659_v46 = vsel %vm643_vm6, %v617_v33, %v651_v40  ;;  %v720_v40 = vpop.permute.xlu1 %719  ;;  %vm955_vm6 = vcmask 130048  }
 0x2c1   :  { %v622_v47 = vadd.f32 %v621_v45, %v494_v39  ;;  %1273 = vmatpush3.bf16.msra.mxu1 %v1270_v41  ;;  %v658_v48 = vsel %vm642_vm7, %v612_v37, %v650_v42  ;;  %v715_v43 = vpop.permute.xlu0 %714 }
 0x2c2   :  { %vm645_vm8 = vcmp.gt.f32.partialorder %v627_v44, 0.0  ;;  %v653_v49 = vmul.f32 0.2, %v627_v44  ;;  %v1274_v50 = vpack.c.bf16 %v659_v46, %v658_v48 }
 0x2c3   :  { %vm644_vm9 = vcmp.gt.f32.partialorder %v622_v47, 0.0  ;;  %v652_v52 = vmul.f32 0.2, %v622_v47  ;;  %v1184_v53 = vpop.f32.mrb[14].mxu0 }
 0x2c4   :  { %v637_v55 = vadd.f32 %v1184_v53, %v509_v51  ;;  %v631_v56 = vpop.f32.mrb[15].mxu0  ;;  %1275 = vmatprep.subr.bf16.mxu1 %v1274_v50  ;;  %v661_v57 = vsel %vm645_vm8, %v627_v44, %v653_v49 }
 0x2c5   :  { %v632_v58 = vadd.f32 %v631_v56, %v504_v54  ;;  %1277 = vmatpush3.bf16.msra.mxu1 %v1274_v50  ;;  %v660_v59 = vsel %vm644_vm9, %v622_v47, %v652_v52  ;;  %v880_v56 = vpop.permute.xlu0 %879 }
 0x2c6   :  { %vm647_vm10 = vcmp.gt.f32.partialorder %v637_v55, 0.0  ;;  %v655_v60 = vmul.f32 0.2, %v637_v55  ;;  %v1278_v61 = vpack.c.bf16 %v661_v57, %v660_v59 }
 0x2c7   :  { %vm646_vm11 = vcmp.gt.f32.partialorder %v632_v58, 0.0  ;;  %v654_v62 = vmul.f32 0.2, %v632_v58 }
 0x2c8   :  { %1279 = vmatprep.subr.bf16.mxu1 %v1278_v61  ;;  %v663_v63 = vsel %vm647_vm10, %v637_v55, %v655_v60  ;;  %v875_v55 = vld [vmem:[%s1623_s3] sm:$0xff] }
 0x2c9   :  { %1281 = vmatpush3.bf16.msra.mxu1 %v1278_v61  ;;  %v662_v0 = vsel %vm646_vm11, %v632_v58, %v654_v62 }
 0x2ca   :  { %v1282_v1 = vpack.c.bf16 %v663_v63, %v662_v0 }
 0x2cc   :  { %1283 = vmatprep.subr.bf16.mxu1 %v1282_v1 }
 0x2cd   :  { %1285 = vmatpush3.bf16.msra.mxu1 %v1282_v1 }
 0x2d0   :  { %1202 = vmatmul.mubr.msk.f32.vlgmr.msra.gmra.mrb[8].mxu1 %vm299_vm2, %v1022_v2 }
 0x2d1   :  { %1204 = vmatprep.mubr.msk.f32.mxu1 %vm299_vm2, %v1023_v3 }
 0x2d4   :  { %1205 = vmatmul.mubr.msk.f32.gmra.mrb[10].mxu1 %vm299_vm2, %v1024_v4 }
 0x2d5   :  { %1207 = vmatprep.mubr.msk.f32.mxu1 %vm299_vm2, %v1025_v5 }
 0x2d8   :  { %1208 = vmatmul.mubr.msk.f32.gmra.mrb[12].mxu1 %vm299_vm2, %v1026_v6 }
 0x2d9   :  { %1210 = vmatprep.mubr.msk.f32.mxu1 %vm299_vm2, %v1027_v7 }
 0x2dc   :  { %1211 = vmatmul.mubr.msk.f32.gmra.mrb[14].mxu1 %vm299_vm2, %v1028_v8 }
 0x3a3   :  { %v1203_v14 = vpop.f32.mrb[8].mxu1 }
 0x3a4   :  { %v818_v16 = vadd.f32 %v1203_v14, %v690_v11  ;;  %v812_v17 = vpop.f32.mrb[9].mxu1 }
 0x3a5   :  { %v813_v18 = vadd.f32 %v812_v17, %v685_v12 }
 0x3a6   :  { %vm852_vm13 = vcmp.gt.f32.partialorder %v818_v16, 0.0  ;;  %v860_v19 = vmul.f32 0.2, %v818_v16 }
 0x3a7   :  { %vm851_vm14 = vcmp.gt.f32.partialorder %v813_v18, 0.0  ;;  %v859_v20 = vmul.f32 0.2, %v813_v18  ;;  %v1206_v21 = vpop.f32.mrb[10].mxu1 }
 0x3a8   :  { %v868_v22 = vsel %vm852_vm13, %v818_v16, %v860_v19  ;;  %v828_v23 = vadd.f32 %v1206_v21, %v700_v13  ;;  %v822_v24 = vpop.f32.mrb[11].mxu1 }
 0x3a9   :  { %v867_v26 = vsel %vm851_vm14, %v813_v18, %v859_v20  ;;  %v823_v27 = vadd.f32 %v822_v24, %v695_v15 }
 0x3aa   :  { %v1287_v29 = vpack.c.bf16 %v868_v22, %v867_v26  ;;  %vm854_vm15 = vcmp.gt.f32.partialorder %v828_v23, 0.0  ;;  %v862_v30 = vmul.f32 0.2, %v828_v23 }
 0x3ab   :  { %vm853_vm0 = vcmp.gt.f32.partialorder %v823_v27, 0.0  ;;  %v861_v31 = vmul.f32 0.2, %v823_v27  ;;  %v1209_v32 = vpop.f32.mrb[12].mxu1 }
 0x3ac   :  { %v870_v33 = vsel %vm854_vm15, %v828_v23, %v862_v30  ;;  %v838_v34 = vadd.f32 %v1209_v32, %v710_v25  ;;  %v832_v35 = vpop.f32.mrb[13].mxu1  ;;  %1288 = vmatpush3.bf16.msra.mxu0 %v1287_v29 }
 0x3ad   :  { %v869_v36 = vsel %vm853_vm0, %v823_v27, %v861_v31  ;;  %v833_v37 = vadd.f32 %v832_v35, %v705_v28  ;;  %1289 = vmatprep.subr.bf16.mxu0 %v1330_v9 }
 0x3ae   :  { %v1290_v38 = vpack.c.bf16 %v870_v33, %v869_v36  ;;  %vm856_vm1 = vcmp.gt.f32.partialorder %v838_v34, 0.0  ;;  %v864_v39 = vmul.f32 0.2, %v838_v34 }
 0x3af   :  { %vm855_vm3 = vcmp.gt.f32.partialorder %v833_v37, 0.0  ;;  %v863_v41 = vmul.f32 0.2, %v833_v37  ;;  %v1212_v42 = vpop.f32.mrb[14].mxu1 }
 0x3b0   :  { %v872_v44 = vsel %vm856_vm1, %v838_v34, %v864_v39  ;;  %v848_v45 = vadd.f32 %v1212_v42, %v720_v40  ;;  %v842_v46 = vpop.f32.mrb[15].mxu1  ;;  %1291 = vmatpush3.bf16.msra.mxu0 %v1290_v38 }
 0x3b1   :  { %v871_v47 = vsel %vm855_vm3, %v833_v37, %v863_v41  ;;  %v843_v48 = vadd.f32 %v842_v46, %v715_v43  ;;  %1292 = vmatprep.subr.bf16.mxu0 %v1330_v9 }
 0x3b2   :  { %v1293_v49 = vpack.c.bf16 %v872_v44, %v871_v47  ;;  %vm858_vm4 = vcmp.gt.f32.partialorder %v848_v45, 0.0  ;;  %v866_v50 = vmul.f32 0.2, %v848_v45 }
 0x3b3   :  { %vm857_vm5 = vcmp.gt.f32.partialorder %v843_v48, 0.0  ;;  %v865_v51 = vmul.f32 0.2, %v843_v48 }
 0x3b4   :  { %v874_v52 = vsel %vm858_vm4, %v848_v45, %v866_v50  ;;  %1294 = vmatpush3.bf16.msra.mxu0 %v1293_v49 }
 0x3b5   :  { %v873_v53 = vsel %vm857_vm5, %v843_v48, %v865_v51  ;;  %1295 = vmatprep.subr.bf16.mxu0 %v1330_v9 }
 0x3b6   :  { %v1296_v54 = vpack.c.bf16 %v874_v52, %v873_v53 }
 0x3b8   :  { %1297 = vmatpush3.bf16.msra.mxu0 %v1296_v54 }
 0x3bb   :  { %1230 = vmatmul.mubr.msk.f32.vlgmr.msra.gmra.mrb[16].mxu0 %vm299_vm2, %v875_v55 }
 0x48e   :  { %v951_v57 = vpop.f32.mrb[16].mxu0 }
 0x48f   :  { %v952_v58 = vadd.f32 %v951_v57, %v880_v56  ;;  %v1231_v59 = vpop.f32.mrb[17].mxu0 }
 0x491   :  { %956 = vst.msk [vmem:[#allocation2] sm:$0xff] %vm955_vm6, %v952_v58 }
 0x492   :  { %1316 = shalt.err (!%p1313_p4)
}
 0x493   :  { %s1317_s27 = scalar_lea.hbm %s1626_s6, 128 }
 0x494   :  { %p1318_p5 = scmp.ne.s32.totalorder %s1626_s6, %s1317_s27  ;;  %p1321_p6 = scmp.lt.u32.totalorder %s1317_s27, %s1626_s6 }
 0x496   :  { %p1323_p7 = pnand %p1321_p6, %p1318_p5 }
 0x498   :  { %1326 = shalt.err (!%p1323_p7)
}
 0x499   :  { %966 = dma.vmem_to_hbm [thread:$0]  %s964_s24, 128, %s1626_s6, [#allocation3]  }
 0x49a   :  { %1327 = dma.done.wait [#allocation3], 128  }
 0x49b   :  { %1328 = vsyncadd [#allocation3], 4294967168 }
 0x49c   :  { %970 = vsyncpa [#allocation3], 1 }

</bundles_post_ra>
